<compile_context>
chip_gen: v6e
topology: v6e:2x2x1
jax: 0.10.0
libtpu: 0.0.40
codegen_flags: <defaults>
</compile_context>

<pallas_src>
import functools

import jax
import jax.numpy as jnp
from jax.experimental import pallas as pl
from jax.experimental.pallas import tpu as pltpu

EPS = 1e-5  # BatchNorm2d default


# --------------------------------------------------------------------------
# Helpers
# --------------------------------------------------------------------------
def _round_up(x, m):
    return ((x + m - 1) // m) * m


def _vmem_capacity_bytes():
    """Generation-aware VMEM capacity (falls back to the smallest, v7x)."""
    try:
        return int(pltpu.get_tpu_info().vmem_capacity_bytes)
    except Exception:
        return 64 * 1024 * 1024


def _conv1x1(w, x):
    """(Cout, Cin) f32  @  (Cin, L) -> (Cout, L) f32.

    For Cin below the f32 sublane quantum (8) an MXU tile would be mostly
    padding, so the 1x1 conv is done as Cin broadcast-FMAs on the VPU
    instead; otherwise it goes to the MXU with f32 accumulation."""
    cout, cin = w.shape
    del cout
    if cin < 8:
        acc = w[:, 0:1] * x[0:1, :].astype(jnp.float32)
        for i in range(1, cin):
            acc = acc + w[:, i:i + 1] * x[i:i + 1, :].astype(jnp.float32)
        return acc
    return jnp.dot(w, x, preferred_element_type=jnp.float32)


def _choose_tiling(hw, cin, cout, x_itemsize, target_tile_bytes):
    """Lane-axis tile width (multiple of 128) and the padded HW.

    Avoids the two degenerate cases: never collapses to 128-wide tiles for
    awkward HW factors, and never falls back to a single full-width block
    that can blow the VMEM budget -- HW is padded up to tm * num_tiles
    (zero padding is exact for the statistics)."""
    per_col = cin * x_itemsize + cout * 4          # bytes per spatial column
    tm_target = max(512, ((target_tile_bytes // per_col) // 128) * 128)
    if tm_target >= hw:
        tm = _round_up(hw, 128)
        return tm, tm
    num_tiles = max(1, int(round(hw / tm_target)))
    tm = _round_up(-(-hw // num_tiles), 128)
    return tm, tm * num_tiles


# --------------------------------------------------------------------------
# Path A: single fused kernel (x resident in VMEM, read from HBM once)
# --------------------------------------------------------------------------
def _make_fused_kernel(n_batch, inv_m, eps):
    """Phase 0: accumulate batch moments of the (bias-free) conv output over
    the whole VMEM-resident x.  Then fold stats + BN affine into the weights
    in-kernel.  Phase 1: replay the resident x through conv + shift + ReLU."""

    def kernel(x_ref, w_ref, gamma_ref, beta_ref, o_ref):
        w = w_ref[...]                                     # (Cout, Cin) f32
        cout = w.shape[0]

        ysum = jnp.zeros((cout, 1), jnp.float32)
        ysq = jnp.zeros((cout, 1), jnp.float32)
        for n in range(n_batch):                           # static unroll (small N)
            y = _conv1x1(w, x_ref[n])                      # (Cout, HW) f32, VMEM only
            ysum = ysum + jnp.sum(y, axis=1, keepdims=True)
            ysq = ysq + jnp.sum(y * y, axis=1, keepdims=True)

        # TODO(synk): one-pass variance (E[y^2] - mean^2) can lose precision
        # when |mean| >> std of the conv output; fine for activation-scale data.
        mean = ysum * inv_m                                # bias-free mean (bias cancels)
        var = jnp.maximum(ysq * inv_m - mean * mean, 0.0)
        inv_std = jax.lax.rsqrt(var + eps)
        scale = gamma_ref[...] * inv_std                   # (Cout, 1)
        shift = beta_ref[...] - mean * scale               # (Cout, 1)
        w_fold = w * scale                                 # (Cout, Cin)

        for n in range(n_batch):
            y = _conv1x1(w_fold, x_ref[n])
            o_ref[n] = jnp.maximum(y + shift, 0.0).astype(o_ref.dtype)

    return kernel


# --------------------------------------------------------------------------
# Path B: tiled two-pass fallback (stats-only pass, then fused conv+BN+ReLU)
# --------------------------------------------------------------------------
def _stats_kernel(x_ref, w_ref, sum_ref, sq_ref):
    """Per-(batch, spatial-chunk) sum / sum-of-squares of the (bias-free)
    1x1-conv output, accumulated over the innermost (arbitrary) grid axis.
    Outputs are tiny; no large intermediate is written back to HBM."""
    j = pl.program_id(2)

    @pl.when(j == 0)
    def _():
        sum_ref[...] = jnp.zeros_like(sum_ref)
        sq_ref[...] = jnp.zeros_like(sq_ref)

    y = _conv1x1(w_ref[...], x_ref[0])                     # (Cout, tm) f32
    sum_ref[0] += jnp.sum(y, axis=1, keepdims=True)
    sq_ref[0] += jnp.sum(y * y, axis=1, keepdims=True)


def _conv_bn_relu_kernel(x_ref, w_ref, shift_ref, o_ref):
    """Fused 1x1 conv (BN scale folded into the weights) + shift + ReLU."""
    y = _conv1x1(w_ref[...], x_ref[0])
    o_ref[0] = jnp.maximum(y + shift_ref[...], 0.0).astype(o_ref.dtype)


# --------------------------------------------------------------------------
# Wrapper
# --------------------------------------------------------------------------
def align_module_forward(x_nchw, w, b, gamma, beta, *, force_two_pass=False):
    """ReLU(BatchNorm2d(Conv2d_1x1(x))) with training-mode (batch) statistics.
    Output dtype matches the input dtype; accumulation is f32."""
    N, Cin, H, W = x_nchw.shape
    Cout = w.shape[0]
    HW = H * W
    M = N * HW

    # Free reshapes only -- data stays channels-first / NCHW throughout.
    x3d = x_nchw.reshape(N, Cin, HW)                       # native dtype (no f32 force)
    w2d = w.reshape(Cout, Cin).astype(jnp.float32)
    del b  # conv bias cancels exactly under training-mode BatchNorm
    gamma2d = gamma.astype(jnp.float32).reshape(Cout, 1)
    beta2d = beta.astype(jnp.float32).reshape(Cout, 1)

    out_dtype = x_nchw.dtype
    x_itemsize = jnp.dtype(x_nchw.dtype).itemsize
    out_itemsize = jnp.dtype(out_dtype).itemsize

    cap = _vmem_capacity_bytes()
    vmem_limit = int(min(cap * 3 // 4, 96 * 1024 * 1024))

    conv_flops = 2 * M * Cin * Cout
    x_bytes = N * Cin * HW * x_itemsize
    out_bytes = N * Cout * HW * out_itemsize

    # ---- Path A: fused single-pass kernel when x (+out +f32 temps) fits. ----
    fused_bytes = (x_bytes + out_bytes
                   + (Cin + Cout) * HW * 4                 # per-batch f32 temporaries
                   + (1 << 20))                            # slack for compiler scratch
    if (not force_two_pass) and fused_bytes <= (vmem_limit * 3) // 5:
        out3d = pl.pallas_call(
            _make_fused_kernel(N, 1.0 / M, EPS),
            out_shape=jax.ShapeDtypeStruct((N, Cout, HW), out_dtype),
            in_specs=[
                pl.BlockSpec(memory_space=pltpu.MemorySpace.VMEM),
                pl.BlockSpec(memory_space=pltpu.MemorySpace.VMEM),
                pl.BlockSpec(memory_space=pltpu.MemorySpace.VMEM),
                pl.BlockSpec(memory_space=pltpu.MemorySpace.VMEM),
            ],
            out_specs=pl.BlockSpec(memory_space=pltpu.MemorySpace.VMEM),
            compiler_params=pltpu.CompilerParams(vmem_limit_bytes=vmem_limit),
            cost_estimate=pl.CostEstimate(
                flops=2 * conv_flops,                      # stats conv + output conv
                transcendentals=Cout,
                bytes_accessed=x_bytes + out_bytes),
        )(x3d, w2d, gamma2d, beta2d)
        return out3d.reshape(N, Cout, H, W)

    # ---- Path B: two tiled passes. ------------------------------------------
    target_tile_bytes = min(8 * 1024 * 1024, vmem_limit // 8)
    tm, hw_pad = _choose_tiling(HW, Cin, Cout, x_itemsize, target_tile_bytes)
    if hw_pad != HW:
        # Zero columns add nothing to the (bias-free) sums and we divide by
        # the true M, so the statistics stay exact; padded outputs are sliced.
        x3d = jnp.pad(x3d, ((0, 0), (0, 0), (0, hw_pad - HW)))
    num_tiles = hw_pad // tm

    # Split the HW tiles into parallel chunks so v7x's two TensorCores stay
    # busy even when N == 1; within a chunk tiles are a sequential reduction.
    n_chunks = 2 if (num_tiles >= 2 and num_tiles % 2 == 0) else 1
    tiles_per_chunk = num_tiles // n_chunks

    # Pass 1: batch statistics only (tiny per-(batch, chunk) partials).
    psum, psq = pl.pallas_call(
        _stats_kernel,
        out_shape=(
            jax.ShapeDtypeStruct((N * n_chunks, Cout, 1), jnp.float32),
            jax.ShapeDtypeStruct((N * n_chunks, Cout, 1), jnp.float32),
        ),
        grid_spec=pltpu.PrefetchScalarGridSpec(
            num_scalar_prefetch=0,
            grid=(N, n_chunks, tiles_per_chunk),
            in_specs=[
                pl.BlockSpec((1, Cin, tm),
                             lambda n, c, j: (n, 0, c * tiles_per_chunk + j)),
                pl.BlockSpec((Cout, Cin), lambda n, c, j: (0, 0)),
            ],
            out_specs=(
                pl.BlockSpec((1, Cout, 1),
                             lambda n, c, j: (n * n_chunks + c, 0, 0)),
                pl.BlockSpec((1, Cout, 1),
                             lambda n, c, j: (n * n_chunks + c, 0, 0)),
            ),
        ),
        compiler_params=pltpu.CompilerParams(
            dimension_semantics=("parallel", "parallel", "arbitrary"),
            vmem_limit_bytes=vmem_limit,
        ),
        cost_estimate=pl.CostEstimate(
            flops=2 * N * hw_pad * Cin * Cout,
            transcendentals=0,
            bytes_accessed=N * Cin * hw_pad * x_itemsize),
    )(x3d, w2d)

    # Glue: fold batch stats + BN affine into the conv weights.
    mean = jnp.sum(psum, axis=0) / M                       # (Cout, 1), bias-free
    ey2 = jnp.sum(psq, axis=0) / M
    var = jnp.maximum(ey2 - mean * mean, 0.0)
    inv_std = jax.lax.rsqrt(var + EPS)
    scale = gamma2d * inv_std                              # (Cout, 1)
    shift = beta2d - mean * scale                          # (Cout, 1)
    w_fold = w2d * scale                                   # (Cout, Cin)

    # Pass 2: fused conv + BN + ReLU; one read of x, one lane-dense write.
    out3d = pl.pallas_call(
        _conv_bn_relu_kernel,
        out_shape=jax.ShapeDtypeStruct((N, Cout, hw_pad), out_dtype),
        grid_spec=pltpu.PrefetchScalarGridSpec(
            num_scalar_prefetch=0,
            grid=(N, num_tiles),
            in_specs=[
                pl.BlockSpec((1, Cin, tm), lambda n, j: (n, 0, j)),
                pl.BlockSpec((Cout, Cin), lambda n, j: (0, 0)),
                pl.BlockSpec((Cout, 1), lambda n, j: (0, 0)),
            ],
            out_specs=pl.BlockSpec((1, Cout, tm), lambda n, j: (n, 0, j)),
        ),
        compiler_params=pltpu.CompilerParams(
            dimension_semantics=("parallel", "parallel"),
            vmem_limit_bytes=vmem_limit,
        ),
        cost_estimate=pl.CostEstimate(
            flops=2 * N * hw_pad * Cin * Cout,
            transcendentals=0,
            bytes_accessed=N * Cin * hw_pad * x_itemsize
            + N * Cout * hw_pad * out_itemsize),
    )(x3d, w_fold, shift)

    if hw_pad != HW:
        out3d = out3d[:, :, :HW]
    return out3d.reshape(N, Cout, H, W)


# --------------------------------------------------------------------------
# Pure-JAX reference (matches PyTorch AlignModule.forward in training mode)
# --------------------------------------------------------------------------
def _reference(x_nchw, w, b, gamma, beta):
    y = jax.lax.conv_general_dilated(
        x_nchw.astype(jnp.float32), w.astype(jnp.float32),
        window_strides=(1, 1), padding="VALID",
        dimension_numbers=("NCHW", "OIHW", "NCHW"),
    ) + b.reshape(1, -1, 1, 1)
    mean = y.mean(axis=(0, 2, 3), keepdims=True)
    var = y.var(axis=(0, 2, 3), keepdims=True)             # biased batch variance
    yn = (y - mean) / jnp.sqrt(var + EPS)
    return jnp.maximum(yn * gamma.reshape(1, -1, 1, 1)
                       + beta.reshape(1, -1, 1, 1), 0.0)


if __name__ == "__main__":
    # Small shapes consistent with the module: N=2, C_in=4, C_out=8, H=W=16.
    N, Cin, Cout, H, W = 2, 4, 8, 16, 16

    key = jax.random.PRNGKey(0)
    kx, kw, kb, kg, kbeta = jax.random.split(key, 5)

    x = jax.random.normal(kx, (N, Cin, H, W), dtype=jnp.float32)
    # Conv2d(in, out, kernel_size=1): weight (out, in, 1, 1), bias (out,)
    w = jax.random.normal(kw, (Cout, Cin, 1, 1), dtype=jnp.float32) * 0.5
    b = jax.random.normal(kb, (Cout,), dtype=jnp.float32) * 0.1
    gamma = 1.0 + 0.1 * jax.random.normal(kg, (Cout,), dtype=jnp.float32)
    beta = 0.1 * jax.random.normal(kbeta, (Cout,), dtype=jnp.float32)

    ref = _reference(x, w, b, gamma, beta)

    # Path A: fused single-pass kernel (x resident in VMEM, read HBM once).
    fwd = jax.jit(align_module_forward)
    out = jax.block_until_ready(fwd(x, w, b, gamma, beta))
    assert out.shape == (N, Cout, H, W)
    assert jnp.allclose(out, ref, atol=1e-4, rtol=1e-4), (
        float(jnp.max(jnp.abs(out - ref))))

    # Path B: tiled two-pass fallback (forced), same inputs.
    fwd2 = jax.jit(functools.partial(align_module_forward, force_two_pass=True))
    out2 = jax.block_until_ready(fwd2(x, w, b, gamma, beta))
    assert jnp.allclose(out2, ref, atol=1e-4, rtol=1e-4), (
        float(jnp.max(jnp.abs(out2 - ref))))

    # Path B with a ragged spatial size (HW not a multiple of 128) to exercise
    # the zero-padded tail handling called out in review.
    H3, W3 = 17, 19
    x3 = jax.random.normal(kx, (1, Cin, H3, W3), dtype=jnp.float32)
    ref3 = _reference(x3, w, b, gamma, beta)
    out3 = jax.block_until_ready(fwd2(x3, w, b, gamma, beta))
    assert out3.shape == (1, Cout, H3, W3)
    assert jnp.allclose(out3, ref3, atol=1e-4, rtol=1e-4), (
        float(jnp.max(jnp.abs(out3 - ref3))))

    print("KERNEL_OK")
</pallas_src>

<mosaic_0001>
module attributes {stable_mosaic.version = 11 : i64} {
  func.func @kernel(%arg0: memref<2x4x256xf32, #tpu.memory_space<vmem>>, %arg1: memref<8x4xf32, #tpu.memory_space<vmem>>, %arg2: memref<8x1xf32, #tpu.memory_space<vmem>>, %arg3: memref<8x1xf32, #tpu.memory_space<vmem>>, %arg4: memref<2x8x256xf32, #tpu.memory_space<vmem>>) attributes {dimension_semantics = [], scalar_prefetch = 0 : i64, scratch_operands = 0 : i64, tpu.core_type = #tpu.core_type<tc>} {
    %c0 = arith.constant 0 : index
    %c0_0 = arith.constant 0 : index
    %0 = vector.load %arg1[%c0, %c0_0] : memref<8x4xf32, #tpu.memory_space<vmem>>, vector<8x4xf32>
    %cst = arith.constant 0.000000e+00 : f32
    %1 = vector.broadcast %cst : f32 to vector<8x1xf32>
    %cst_1 = arith.constant 0.000000e+00 : f32
    %2 = vector.broadcast %cst_1 : f32 to vector<8x1xf32>
    %c0_2 = arith.constant 0 : index
    %c0_3 = arith.constant 0 : index
    %c0_4 = arith.constant 0 : index
    %3 = vector.load %arg0[%c0_2, %c0_3, %c0_4] : memref<2x4x256xf32, #tpu.memory_space<vmem>>, vector<1x4x256xf32>
    %4 = vector.shape_cast %3 : vector<1x4x256xf32> to vector<4x256xf32>
    %5 = vector.extract_strided_slice %0 {offsets = [0, 0], sizes = [8, 1], strides = [1, 1]} : vector<8x4xf32> to vector<8x1xf32>
    %6 = vector.extract_strided_slice %4 {offsets = [0, 0], sizes = [1, 256], strides = [1, 1]} : vector<4x256xf32> to vector<1x256xf32>
    %7 = vector.broadcast %5 : vector<8x1xf32> to vector<8x256xf32>
    %8 = vector.broadcast %6 : vector<1x256xf32> to vector<8x256xf32>
    %9 = arith.mulf %7, %8 : vector<8x256xf32>
    %10 = vector.extract_strided_slice %0 {offsets = [0, 1], sizes = [8, 1], strides = [1, 1]} : vector<8x4xf32> to vector<8x1xf32>
    %11 = vector.extract_strided_slice %4 {offsets = [1, 0], sizes = [1, 256], strides = [1, 1]} : vector<4x256xf32> to vector<1x256xf32>
    %12 = vector.broadcast %10 : vector<8x1xf32> to vector<8x256xf32>
    %13 = vector.broadcast %11 : vector<1x256xf32> to vector<8x256xf32>
    %14 = arith.mulf %12, %13 : vector<8x256xf32>
    %15 = arith.addf %9, %14 : vector<8x256xf32>
    %16 = vector.extract_strided_slice %0 {offsets = [0, 2], sizes = [8, 1], strides = [1, 1]} : vector<8x4xf32> to vector<8x1xf32>
    %17 = vector.extract_strided_slice %4 {offsets = [2, 0], sizes = [1, 256], strides = [1, 1]} : vector<4x256xf32> to vector<1x256xf32>
    %18 = vector.broadcast %16 : vector<8x1xf32> to vector<8x256xf32>
    %19 = vector.broadcast %17 : vector<1x256xf32> to vector<8x256xf32>
    %20 = arith.mulf %18, %19 : vector<8x256xf32>
    %21 = arith.addf %15, %20 : vector<8x256xf32>
    %22 = vector.extract_strided_slice %0 {offsets = [0, 3], sizes = [8, 1], strides = [1, 1]} : vector<8x4xf32> to vector<8x1xf32>
    %23 = vector.extract_strided_slice %4 {offsets = [3, 0], sizes = [1, 256], strides = [1, 1]} : vector<4x256xf32> to vector<1x256xf32>
    %24 = vector.broadcast %22 : vector<8x1xf32> to vector<8x256xf32>
    %25 = vector.broadcast %23 : vector<1x256xf32> to vector<8x256xf32>
    %26 = arith.mulf %24, %25 : vector<8x256xf32>
    %27 = arith.addf %21, %26 : vector<8x256xf32>
    %cst_5 = arith.constant dense<0.000000e+00> : vector<8xf32>
    %28 = vector.multi_reduction <add>, %27, %cst_5 [1] : vector<8x256xf32> to vector<8xf32>
    %29 = vector.shape_cast %28 : vector<8xf32> to vector<8x1xf32>
    %30 = arith.addf %1, %29 : vector<8x1xf32>
    %31 = arith.mulf %27, %27 : vector<8x256xf32>
    %cst_6 = arith.constant dense<0.000000e+00> : vector<8xf32>
    %32 = vector.multi_reduction <add>, %31, %cst_6 [1] : vector<8x256xf32> to vector<8xf32>
    %33 = vector.shape_cast %32 : vector<8xf32> to vector<8x1xf32>
    %34 = arith.addf %2, %33 : vector<8x1xf32>
    %c1 = arith.constant 1 : index
    %c0_7 = arith.constant 0 : index
    %c0_8 = arith.constant 0 : index
    %35 = vector.load %arg0[%c1, %c0_7, %c0_8] : memref<2x4x256xf32, #tpu.memory_space<vmem>>, vector<1x4x256xf32>
    %36 = vector.shape_cast %35 : vector<1x4x256xf32> to vector<4x256xf32>
    %37 = vector.extract_strided_slice %0 {offsets = [0, 0], sizes = [8, 1], strides = [1, 1]} : vector<8x4xf32> to vector<8x1xf32>
    %38 = vector.extract_strided_slice %36 {offsets = [0, 0], sizes = [1, 256], strides = [1, 1]} : vector<4x256xf32> to vector<1x256xf32>
    %39 = vector.broadcast %37 : vector<8x1xf32> to vector<8x256xf32>
    %40 = vector.broadcast %38 : vector<1x256xf32> to vector<8x256xf32>
    %41 = arith.mulf %39, %40 : vector<8x256xf32>
    %42 = vector.extract_strided_slice %0 {offsets = [0, 1], sizes = [8, 1], strides = [1, 1]} : vector<8x4xf32> to vector<8x1xf32>
    %43 = vector.extract_strided_slice %36 {offsets = [1, 0], sizes = [1, 256], strides = [1, 1]} : vector<4x256xf32> to vector<1x256xf32>
    %44 = vector.broadcast %42 : vector<8x1xf32> to vector<8x256xf32>
    %45 = vector.broadcast %43 : vector<1x256xf32> to vector<8x256xf32>
    %46 = arith.mulf %44, %45 : vector<8x256xf32>
    %47 = arith.addf %41, %46 : vector<8x256xf32>
    %48 = vector.extract_strided_slice %0 {offsets = [0, 2], sizes = [8, 1], strides = [1, 1]} : vector<8x4xf32> to vector<8x1xf32>
    %49 = vector.extract_strided_slice %36 {offsets = [2, 0], sizes = [1, 256], strides = [1, 1]} : vector<4x256xf32> to vector<1x256xf32>
    %50 = vector.broadcast %48 : vector<8x1xf32> to vector<8x256xf32>
    %51 = vector.broadcast %49 : vector<1x256xf32> to vector<8x256xf32>
    %52 = arith.mulf %50, %51 : vector<8x256xf32>
    %53 = arith.addf %47, %52 : vector<8x256xf32>
    %54 = vector.extract_strided_slice %0 {offsets = [0, 3], sizes = [8, 1], strides = [1, 1]} : vector<8x4xf32> to vector<8x1xf32>
    %55 = vector.extract_strided_slice %36 {offsets = [3, 0], sizes = [1, 256], strides = [1, 1]} : vector<4x256xf32> to vector<1x256xf32>
    %56 = vector.broadcast %54 : vector<8x1xf32> to vector<8x256xf32>
    %57 = vector.broadcast %55 : vector<1x256xf32> to vector<8x256xf32>
    %58 = arith.mulf %56, %57 : vector<8x256xf32>
    %59 = arith.addf %53, %58 : vector<8x256xf32>
    %cst_9 = arith.constant dense<0.000000e+00> : vector<8xf32>
    %60 = vector.multi_reduction <add>, %59, %cst_9 [1] : vector<8x256xf32> to vector<8xf32>
    %61 = vector.shape_cast %60 : vector<8xf32> to vector<8x1xf32>
    %62 = arith.addf %30, %61 : vector<8x1xf32>
    %63 = arith.mulf %59, %59 : vector<8x256xf32>
    %cst_10 = arith.constant dense<0.000000e+00> : vector<8xf32>
    %64 = vector.multi_reduction <add>, %63, %cst_10 [1] : vector<8x256xf32> to vector<8xf32>
    %65 = vector.shape_cast %64 : vector<8xf32> to vector<8x1xf32>
    %66 = arith.addf %34, %65 : vector<8x1xf32>
    %cst_11 = arith.constant 0.001953125 : f32
    %67 = vector.broadcast %cst_11 : f32 to vector<8x1xf32>
    %68 = arith.mulf %62, %67 : vector<8x1xf32>
    %cst_12 = arith.constant 0.001953125 : f32
    %69 = vector.broadcast %cst_12 : f32 to vector<8x1xf32>
    %70 = arith.mulf %66, %69 : vector<8x1xf32>
    %71 = arith.mulf %68, %68 : vector<8x1xf32>
    %72 = arith.subf %70, %71 : vector<8x1xf32>
    %cst_13 = arith.constant 0.000000e+00 : f32
    %73 = vector.broadcast %cst_13 : f32 to vector<8x1xf32>
    %74 = arith.maximumf %72, %73 : vector<8x1xf32>
    %cst_14 = arith.constant 9.99999974E-6 : f32
    %75 = vector.broadcast %cst_14 : f32 to vector<8x1xf32>
    %76 = arith.addf %74, %75 : vector<8x1xf32>
    %77 = math.rsqrt %76 : vector<8x1xf32>
    %c0_15 = arith.constant 0 : index
    %c0_16 = arith.constant 0 : index
    %78 = vector.load %arg2[%c0_15, %c0_16] : memref<8x1xf32, #tpu.memory_space<vmem>>, vector<8x1xf32>
    %79 = arith.mulf %78, %77 : vector<8x1xf32>
    %c0_17 = arith.constant 0 : index
    %c0_18 = arith.constant 0 : index
    %80 = vector.load %arg3[%c0_17, %c0_18] : memref<8x1xf32, #tpu.memory_space<vmem>>, vector<8x1xf32>
    %81 = arith.mulf %68, %79 : vector<8x1xf32>
    %82 = arith.subf %80, %81 : vector<8x1xf32>
    %83 = vector.broadcast %79 : vector<8x1xf32> to vector<8x4xf32>
    %84 = arith.mulf %0, %83 : vector<8x4xf32>
    %c0_19 = arith.constant 0 : index
    %c0_20 = arith.constant 0 : index
    %c0_21 = arith.constant 0 : index
    %85 = vector.load %arg0[%c0_19, %c0_20, %c0_21] : memref<2x4x256xf32, #tpu.memory_space<vmem>>, vector<1x4x256xf32>
    %86 = vector.shape_cast %85 : vector<1x4x256xf32> to vector<4x256xf32>
    %87 = vector.extract_strided_slice %84 {offsets = [0, 0], sizes = [8, 1], strides = [1, 1]} : vector<8x4xf32> to vector<8x1xf32>
    %88 = vector.extract_strided_slice %86 {offsets = [0, 0], sizes = [1, 256], strides = [1, 1]} : vector<4x256xf32> to vector<1x256xf32>
    %89 = vector.broadcast %87 : vector<8x1xf32> to vector<8x256xf32>
    %90 = vector.broadcast %88 : vector<1x256xf32> to vector<8x256xf32>
    %91 = arith.mulf %89, %90 : vector<8x256xf32>
    %92 = vector.extract_strided_slice %84 {offsets = [0, 1], sizes = [8, 1], strides = [1, 1]} : vector<8x4xf32> to vector<8x1xf32>
    %93 = vector.extract_strided_slice %86 {offsets = [1, 0], sizes = [1, 256], strides = [1, 1]} : vector<4x256xf32> to vector<1x256xf32>
    %94 = vector.broadcast %92 : vector<8x1xf32> to vector<8x256xf32>
    %95 = vector.broadcast %93 : vector<1x256xf32> to vector<8x256xf32>
    %96 = arith.mulf %94, %95 : vector<8x256xf32>
    %97 = arith.addf %91, %96 : vector<8x256xf32>
    %98 = vector.extract_strided_slice %84 {offsets = [0, 2], sizes = [8, 1], strides = [1, 1]} : vector<8x4xf32> to vector<8x1xf32>
    %99 = vector.extract_strided_slice %86 {offsets = [2, 0], sizes = [1, 256], strides = [1, 1]} : vector<4x256xf32> to vector<1x256xf32>
    %100 = vector.broadcast %98 : vector<8x1xf32> to vector<8x256xf32>
    %101 = vector.broadcast %99 : vector<1x256xf32> to vector<8x256xf32>
    %102 = arith.mulf %100, %101 : vector<8x256xf32>
    %103 = arith.addf %97, %102 : vector<8x256xf32>
    %104 = vector.extract_strided_slice %84 {offsets = [0, 3], sizes = [8, 1], strides = [1, 1]} : vector<8x4xf32> to vector<8x1xf32>
    %105 = vector.extract_strided_slice %86 {offsets = [3, 0], sizes = [1, 256], strides = [1, 1]} : vector<4x256xf32> to vector<1x256xf32>
    %106 = vector.broadcast %104 : vector<8x1xf32> to vector<8x256xf32>
    %107 = vector.broadcast %105 : vector<1x256xf32> to vector<8x256xf32>
    %108 = arith.mulf %106, %107 : vector<8x256xf32>
    %109 = arith.addf %103, %108 : vector<8x256xf32>
    %110 = vector.broadcast %82 : vector<8x1xf32> to vector<8x256xf32>
    %111 = arith.addf %109, %110 : vector<8x256xf32>
    %cst_22 = arith.constant 0.000000e+00 : f32
    %112 = vector.broadcast %cst_22 : f32 to vector<8x256xf32>
    %113 = arith.maximumf %111, %112 : vector<8x256xf32>
    %c0_23 = arith.constant 0 : index
    %c0_24 = arith.constant 0 : index
    %c0_25 = arith.constant 0 : index
    %114 = vector.load %arg4[%c0_23, %c0_24, %c0_25] : memref<2x8x256xf32, #tpu.memory_space<vmem>>, vector<1x8x256xf32>
    %115 = vector.shape_cast %114 : vector<1x8x256xf32> to vector<8x256xf32>
    %116 = vector.shape_cast %113 : vector<8x256xf32> to vector<1x8x256xf32>
    tpu.vector_store %arg4[%c0_23, %c0_24, %c0_25], %116 {strides = array<i32>} : memref<2x8x256xf32, #tpu.memory_space<vmem>>, vector<1x8x256xf32>,
    %c1_26 = arith.constant 1 : index
    %c0_27 = arith.constant 0 : index
    %c0_28 = arith.constant 0 : index
    %117 = vector.load %arg0[%c1_26, %c0_27, %c0_28] : memref<2x4x256xf32, #tpu.memory_space<vmem>>, vector<1x4x256xf32>
    %118 = vector.shape_cast %117 : vector<1x4x256xf32> to vector<4x256xf32>
    %119 = vector.extract_strided_slice %84 {offsets = [0, 0], sizes = [8, 1], strides = [1, 1]} : vector<8x4xf32> to vector<8x1xf32>
    %120 = vector.extract_strided_slice %118 {offsets = [0, 0], sizes = [1, 256], strides = [1, 1]} : vector<4x256xf32> to vector<1x256xf32>
    %121 = vector.broadcast %119 : vector<8x1xf32> to vector<8x256xf32>
    %122 = vector.broadcast %120 : vector<1x256xf32> to vector<8x256xf32>
    %123 = arith.mulf %121, %122 : vector<8x256xf32>
    %124 = vector.extract_strided_slice %84 {offsets = [0, 1], sizes = [8, 1], strides = [1, 1]} : vector<8x4xf32> to vector<8x1xf32>
    %125 = vector.extract_strided_slice %118 {offsets = [1, 0], sizes = [1, 256], strides = [1, 1]} : vector<4x256xf32> to vector<1x256xf32>
    %126 = vector.broadcast %124 : vector<8x1xf32> to vector<8x256xf32>
    %127 = vector.broadcast %125 : vector<1x256xf32> to vector<8x256xf32>
    %128 = arith.mulf %126, %127 : vector<8x256xf32>
    %129 = arith.addf %123, %128 : vector<8x256xf32>
    %130 = vector.extract_strided_slice %84 {offsets = [0, 2], sizes = [8, 1], strides = [1, 1]} : vector<8x4xf32> to vector<8x1xf32>
    %131 = vector.extract_strided_slice %118 {offsets = [2, 0], sizes = [1, 256], strides = [1, 1]} : vector<4x256xf32> to vector<1x256xf32>
    %132 = vector.broadcast %130 : vector<8x1xf32> to vector<8x256xf32>
    %133 = vector.broadcast %131 : vector<1x256xf32> to vector<8x256xf32>
    %134 = arith.mulf %132, %133 : vector<8x256xf32>
    %135 = arith.addf %129, %134 : vector<8x256xf32>
    %136 = vector.extract_strided_slice %84 {offsets = [0, 3], sizes = [8, 1], strides = [1, 1]} : vector<8x4xf32> to vector<8x1xf32>
    %137 = vector.extract_strided_slice %118 {offsets = [3, 0], sizes = [1, 256], strides = [1, 1]} : vector<4x256xf32> to vector<1x256xf32>
    %138 = vector.broadcast %136 : vector<8x1xf32> to vector<8x256xf32>
    %139 = vector.broadcast %137 : vector<1x256xf32> to vector<8x256xf32>
    %140 = arith.mulf %138, %139 : vector<8x256xf32>
    %141 = arith.addf %135, %140 : vector<8x256xf32>
    %142 = vector.broadcast %82 : vector<8x1xf32> to vector<8x256xf32>
    %143 = arith.addf %141, %142 : vector<8x256xf32>
    %cst_29 = arith.constant 0.000000e+00 : f32
    %144 = vector.broadcast %cst_29 : f32 to vector<8x256xf32>
    %145 = arith.maximumf %143, %144 : vector<8x256xf32>
    %c1_30 = arith.constant 1 : index
    %c0_31 = arith.constant 0 : index
    %c0_32 = arith.constant 0 : index
    %146 = vector.load %arg4[%c1_30, %c0_31, %c0_32] : memref<2x8x256xf32, #tpu.memory_space<vmem>>, vector<1x8x256xf32>
    %147 = vector.shape_cast %146 : vector<1x8x256xf32> to vector<8x256xf32>
    %148 = vector.shape_cast %145 : vector<8x256xf32> to vector<1x8x256xf32>
    tpu.vector_store %arg4[%c1_30, %c0_31, %c0_32], %148 {strides = array<i32>} : memref<2x8x256xf32, #tpu.memory_space<vmem>>, vector<1x8x256xf32>,
    return
  }
}

</mosaic_0001>

<bundles_post_ra>
// kernel: align_module_forward.1
= control target key start
LH: loop header
LB: loop body
LE: loop exit
PB: predicated region body
PF: predicated region fallthrough
CT: control target
= control target key end

     0   :  { %v411_v0 = vmov 0   ;;  %v412_v2 = vmov 2   ;;  %v413_v3 = vmov 1   ;;  %v414_v4 = vmov 3   ;;  %s548_s1 = inlined_call_operand.vmem [shape: f32[8,4], index: 1, kind: input, shape index: {}]   ;;  %s549_s0 = inlined_call_operand.vmem [shape: f32[2,4,256], index: 0, kind: input, shape index: {}]   ;;  %s550_s2 = inlined_call_operand.vmem [shape: f32[8,1], index: 2, kind: input, shape index: {}]   ;;  %s551_s3 = inlined_call_operand.vmem [shape: f32[8,1], index: 3, kind: input, shape index: {}]   ;;  %s552_s4 = inlined_call_operand.vmem [shape: f32[2,8,256], index: 4, kind: output, shape index: {}]  }
   0x1   :  { %399 = vset.pattern.permute.xlu0 %v411_v0  ;;  %v444_v1 = vld [vmem:[%s548_s1] sm:$0xff]  ;;  %401 = vset.pattern.permute.xlu1 %v412_v2  ;;  %v25_v5 = vlaneseq  ;;  %v391_v10 = vld [vmem:[%s549_s0 + $0x8] sm:$0xff] }
   0x2   :  { %21 = vperm.xlu0 %399, %v444_v1   ;;  %72 = vperm.xlu1 %401, %v444_v1   ;;  %v18_v9 = vld [vmem:[%s549_s0] sm:$0xff] }
   0x3   :  { %v26_v6 = vshrl.u32 %v25_v5, 7 }
   0x5   :  { %v27_v7 = vsub.s32 0, %v26_v6  ;;  %v31_v8 = vsub.s32 4, %v26_v6  ;;  %v77_v11 = vsub.s32 2, %v26_v6  ;;  %v81_v12 = vsub.s32 6, %v26_v6 }
   0x6   :  { %400 = vset.pattern.permute.xlu0 %v413_v3  ;;  %402 = vset.pattern.permute.xlu1 %v414_v4  ;;  %v51_v13 = vsub.s32 1, %v26_v6  ;;  %v55_v14 = vsub.s32 5, %v26_v6  ;;  %v103_v15 = vsub.s32 3, %v26_v6  ;;  %v107_v16 = vsub.s32 7, %v26_v6 }
   0x7   :  { %46 = vperm.xlu0 %400, %v444_v1   ;;  %98 = vperm.xlu1 %402, %v444_v1   ;;  %v28_v17 = vrot.slane %v18_v9, %v27_v7  ;;  %v32_v18 = vrot.slane %v18_v9, %v31_v8  ;;  %v139_v19 = vrot.slane %v391_v10, %v27_v7 }
   0x8   :  { %v143_v20 = vrot.slane %v391_v10, %v31_v8  ;;  %v78_v21 = vrot.slane %v18_v9, %v77_v11  ;;  %v82_v22 = vrot.slane %v18_v9, %v81_v12  ;;  %v181_v23 = vrot.slane %v391_v10, %v77_v11 }
   0x9   :  { %v185_v24 = vrot.slane %v391_v10, %v81_v12  ;;  %v52_v25 = vrot.slane %v18_v9, %v51_v13  ;;  %v56_v26 = vrot.slane %v18_v9, %v55_v14  ;;  %v159_v27 = vrot.slane %v391_v10, %v51_v13 }
   0xa   :  { %v163_v28 = vrot.slane %v391_v10, %v55_v14  ;;  %v203_v29 = vrot.slane %v391_v10, %v103_v15  ;;  %v207_v30 = vrot.slane %v391_v10, %v107_v16  ;;  %v104_v31 = vrot.slane %v18_v9, %v103_v15 }
   0xb   :  { %403 = vset.pattern.permute.xlu0 %v411_v0  ;;  %404 = vset.pattern.permute.xlu1 %v411_v0  ;;  %v108_v32 = vrot.slane %v18_v9, %v107_v16  ;;  %v461_v34 = vrot.slane %v28_v17, %v27_v7  ;;  %v463_v35 = vrot.slane %v32_v18, %v27_v7 }
   0xc   :  { %v465_v36 = vrot.slane %v139_v19, %v27_v7  ;;  %v467_v37 = vrot.slane %v143_v20, %v27_v7  ;;  %v469_v39 = vrot.slane %v78_v21, %v77_v11  ;;  %v471_v40 = vrot.slane %v82_v22, %v77_v11 }
   0xd   :  { %v473_v41 = vrot.slane %v181_v23, %v77_v11  ;;  %v475_v42 = vrot.slane %v185_v24, %v77_v11  ;;  %v477_v43 = vrot.slane %v52_v25, %v51_v13  ;;  %v479_v44 = vrot.slane %v56_v26, %v51_v13 }
   0xe   :  { %v481_v45 = vrot.slane %v159_v27, %v51_v13  ;;  %v483_v46 = vrot.slane %v163_v28, %v51_v13  ;;  %v485_v47 = vrot.slane %v203_v29, %v103_v15  ;;  %v487_v48 = vrot.slane %v207_v30, %v103_v15 }
   0xf   :  { %v489_v49 = vrot.slane %v104_v31, %v103_v15  ;;  %v491_v50 = vrot.slane %v108_v32, %v103_v15 }
  0x7d   :  { %v22_v33 = vpop.permute.xlu0 %21  ;;  %v73_v38 = vpop.permute.xlu1 %72 }
  0x7e   :  { %v43_v51 = vmul.f32 %v461_v34, %v22_v33  ;;  %v44_v52 = vmul.f32 %v463_v35, %v22_v33  ;;  %v154_v53 = vmul.f32 %v465_v36, %v22_v33  ;;  %v155_v54 = vmul.f32 %v467_v37, %v22_v33 }
  0x7f   :  { %v93_v55 = vmul.f32 %v469_v39, %v73_v38  ;;  %v94_v56 = vmul.f32 %v471_v40, %v73_v38  ;;  %v196_v57 = vmul.f32 %v473_v41, %v73_v38  ;;  %v197_v58 = vmul.f32 %v475_v42, %v73_v38 }
  0x82   :  { %v47_v59 = vpop.permute.xlu0 %46  ;;  %v99_v60 = vpop.permute.xlu1 %98 }
  0x83   :  { %v67_v61 = vmul.f32 %v477_v43, %v47_v59  ;;  %v68_v62 = vmul.f32 %v479_v44, %v47_v59  ;;  %v174_v63 = vmul.f32 %v481_v45, %v47_v59  ;;  %v175_v5 = vmul.f32 %v483_v46, %v47_v59 }
  0x84   :  { %v218_v6 = vmul.f32 %v485_v47, %v99_v60  ;;  %v219_v7 = vmul.f32 %v487_v48, %v99_v60  ;;  %v119_v8 = vmul.f32 %v489_v49, %v99_v60  ;;  %v120_v9 = vmul.f32 %v491_v50, %v99_v60 }
  0x85   :  { %v176_v10 = vadd.f32 %v174_v63, %v154_v53  ;;  %v177_v11 = vadd.f32 %v175_v5, %v155_v54  ;;  %v69_v12 = vadd.f32 %v67_v61, %v43_v51  ;;  %v70_v13 = vadd.f32 %v68_v62, %v44_v52  ;;  %v241_v5 = vld [vmem:[%s551_s3] sm:$0xff] }
  0x87   :  { %v198_v14 = vadd.f32 %v196_v57, %v176_v10  ;;  %v199_v15 = vadd.f32 %v197_v58, %v177_v11  ;;  %v95_v16 = vadd.f32 %v93_v55, %v69_v12  ;;  %v96_v17 = vadd.f32 %v94_v56, %v70_v13  ;;  %v239_v58 = vld [vmem:[%s550_s2] sm:$0xff] }
  0x89   :  { %v220_v18 = vadd.f32 %v218_v6, %v198_v14  ;;  %v221_v19 = vadd.f32 %v219_v7, %v199_v15  ;;  %v121_v20 = vadd.f32 %v119_v8, %v95_v16  ;;  %v122_v21 = vadd.f32 %v120_v9, %v96_v17 }
  0x8b   :  { %v222_v22 = vadd.f32 %v221_v19, %v220_v18  ;;  %v123_v23 = vadd.f32 %v122_v21, %v121_v20  ;;  %v127_v24 = vmul.f32 %v121_v20, %v121_v20  ;;  %v128_v25 = vmul.f32 %v122_v21, %v122_v21 }
  0x8c   :  { %v226_v26 = vmul.f32 %v220_v18, %v220_v18  ;;  %v227_v27 = vmul.f32 %v221_v19, %v221_v19 }
  0x8d   :  { %223 = vadd.xlane.f32.xlu0 %v222_v22  ;;  %124 = vadd.xlane.f32.xlu1 %v123_v23  ;;  %v129_v28 = vadd.f32 %v128_v25, %v127_v24 }
  0x8e   :  { %v228_v29 = vadd.f32 %v227_v27, %v226_v26 }
  0x91   :  { %130 = vadd.xlane.f32.xlu0 %v129_v28  ;;  %229 = vadd.xlane.f32.xlu1 %v228_v29 }
 0x116   :  { %v224_v30 = vpop.xlane.xlu0 %223  ;;  %v125_v31 = vpop.xlane.xlu1 %124 }
 0x117   :  { %v225_v32 = vadd.f32 %v224_v30, %v125_v31 }
 0x119   :  { %v232_v33 = vmul.f32 0.001953125, %v225_v32 }
 0x11a   :  { %v131_v38 = vpop.xlane.xlu0 %130  ;;  %v230_v51 = vpop.xlane.xlu1 %229 }
 0x11b   :  { %v231_v52 = vadd.f32 %v230_v51, %v131_v38  ;;  %v234_v53 = vmul.f32 %v232_v33, %v232_v33 }
 0x11d   :  { %v233_v54 = vmul.f32 0.001953125, %v231_v52 }
 0x11f   :  { %v235_v55 = vsub.f32 %v233_v54, %v234_v53 }
 0x121   :  { %v236_v56 = vmax.f32 %v235_v55, 0.0 }
 0x123   :  { %v237_v57 = vadd.f32 1e-05, %v236_v56 }
 0x125   :  { %409 = vrsqrt.f32 %v237_v57 }
 0x132   :  { %v410_v59 = vpop.eup %409 }
 0x133   :  { %v240_v60 = vmul.f32 %v410_v59, %v239_v58 }
 0x135   :  { %246 = vperm.xlu0 %403, %v240_v60   ;;  %v242_v61 = vmul.f32 %v240_v60, %v232_v33 }
 0x137   :  { %v243_v6 = vsub.f32 %v241_v5, %v242_v61 }
 0x1b0   :  { %v247_v62 = vpop.permute.xlu0 %246 }
 0x1b1   :  { %v249_v63 = vmul.f32 %v247_v62, %v444_v1 }
 0x1b3   :  { %252 = vperm.xlu1 %404, %v249_v63  }
 0x1b7   :  { %405 = vset.pattern.permute.xlu1 %v413_v3 }
 0x1b8   :  { %258 = vperm.xlu1 %405, %v249_v63  }
 0x1bc   :  { %406 = vset.pattern.permute.xlu1 %v412_v2 }
 0x1bd   :  { %266 = vperm.xlu1 %406, %v249_v63  }
 0x1c1   :  { %407 = vset.pattern.permute.xlu1 %v414_v4 }
 0x1c2   :  { %274 = vperm.xlu1 %407, %v249_v63  }
 0x1c6   :  { %408 = vset.pattern.permute.xlu1 %v411_v0 }
 0x1c7   :  { %283 = vperm.xlu1 %408, %v243_v6  }
 0x22e   :  { %v253_v7 = vpop.permute.xlu1 %252 }
 0x22f   :  { %v255_v4 = vmul.f32 %v253_v7, %v461_v34  ;;  %v256_v10 = vmul.f32 %v253_v7, %v463_v35  ;;  %v312_v11 = vmul.f32 %v253_v7, %v465_v36  ;;  %v313_v12 = vmul.f32 %v253_v7, %v467_v37 }
 0x233   :  { %v259_v1 = vpop.permute.xlu1 %258 }
 0x234   :  { %v261_v8 = vmul.f32 %v259_v1, %v477_v43  ;;  %v262_v3 = vmul.f32 %v259_v1, %v479_v44  ;;  %v332_v2 = vmul.f32 %v259_v1, %v481_v45  ;;  %v333_v9 = vmul.f32 %v259_v1, %v483_v46 }
 0x236   :  { %v263_v45 = vadd.f32 %v261_v8, %v255_v4  ;;  %v264_v15 = vadd.f32 %v262_v3, %v256_v10  ;;  %v334_v46 = vadd.f32 %v332_v2, %v312_v11  ;;  %v335_v16 = vadd.f32 %v333_v9, %v313_v12 }
 0x238   :  { %v267_v0 = vpop.permute.xlu1 %266 }
 0x239   :  { %v269_v13 = vmul.f32 %v267_v0, %v469_v39  ;;  %v270_v14 = vmul.f32 %v267_v0, %v471_v40  ;;  %v354_v43 = vmul.f32 %v267_v0, %v473_v41  ;;  %v355_v44 = vmul.f32 %v267_v0, %v475_v42 }
 0x23b   :  { %v271_v17 = vadd.f32 %v269_v13, %v263_v45  ;;  %v272_v35 = vadd.f32 %v270_v14, %v264_v15  ;;  %v356_v18 = vadd.f32 %v354_v43, %v334_v46  ;;  %v357_v36 = vadd.f32 %v355_v44, %v335_v16 }
 0x23d   :  { %v275_v34 = vpop.permute.xlu1 %274 }
 0x23e   :  { %v277_v37 = vmul.f32 %v275_v34, %v489_v49  ;;  %v278_v19 = vmul.f32 %v275_v34, %v491_v50  ;;  %v376_v39 = vmul.f32 %v275_v34, %v485_v47  ;;  %v377_v40 = vmul.f32 %v275_v34, %v487_v48 }
 0x240   :  { %v279_v41 = vadd.f32 %v277_v37, %v271_v17  ;;  %v280_v20 = vadd.f32 %v278_v19, %v272_v35  ;;  %v378_v42 = vadd.f32 %v376_v39, %v356_v18  ;;  %v379_v21 = vadd.f32 %v377_v40, %v357_v36 }
 0x242   :  { %v284_v22 = vpop.permute.xlu1 %283 }
 0x243   :  { %v286_v23 = vadd.f32 %v284_v22, %v279_v41  ;;  %v287_v24 = vadd.f32 %v284_v22, %v280_v20  ;;  %v380_v25 = vadd.f32 %v378_v42, %v284_v22  ;;  %v381_v26 = vadd.f32 %v379_v21, %v284_v22 }
 0x245   :  { %v288_v27 = vmax.f32 %v286_v23, 0.0  ;;  %v289_v28 = vmax.f32 %v287_v24, 0.0  ;;  %v382_v29 = vmax.f32 %v380_v25, 0.0  ;;  %v383_v30 = vmax.f32 %v381_v26, 0.0 }
 0x247   :  { %290 = vst [vmem:[%s552_s4] sm:$0xff] %v288_v27  ;;  %291 = vst [vmem:[%s552_s4 + $0x8] sm:$0xff] %v289_v28 }
 0x248   :  { %393 = vst [vmem:[%s552_s4 + $0x10] sm:$0xff] %v382_v29  ;;  %394 = vst [vmem:[%s552_s4 + $0x18] sm:$0xff] %v383_v30 }

</bundles_post_ra>
